<compile_context>
chip_gen: v7x
topology: tpu7x:2x2x1
jax: 0.10.0
libtpu: 0.0.40
codegen_flags: <defaults>
</compile_context>

<pallas_src>
import numpy as np
import jax
import jax.numpy as jnp
from jax import lax
from jax.experimental import pallas as pl
from jax.experimental.pallas import tpu as pltpu


# --------------------------------------------------------------------------
# Parameter sampling + inverse affine coefficients (tiny; plain JAX glue)
# --------------------------------------------------------------------------
def sample_affine_coefs(key, N, H, W, *, translate=0.1, scale=(0.7, 0.7), shear=30.0):
    """Sample kornia-RandomAffine-style parameters (degrees=0, x-shear only) and
    return the inverse (dst->src) affine coefficients packed as (N, 8) float32:

        x_src = a00*j + a01*i + a02
        y_src = a11*i + a12           (a10 == 0 exactly: no rotation, no y-shear)

    layout: [a00, a01, a02, a11, a12, 0, 0, 0]
    """
    k_tx, k_ty, k_sh, k_sc = jax.random.split(key, 4)
    cx = (W - 1) / 2.0
    cy = (H - 1) / 2.0
    max_dx = translate * W
    max_dy = translate * H

    tx = jax.random.uniform(k_tx, (N,), jnp.float32, -max_dx, max_dx)
    ty = jax.random.uniform(k_ty, (N,), jnp.float32, -max_dy, max_dy)
    sx_deg = jax.random.uniform(k_sh, (N,), jnp.float32, -shear, shear)
    s = jax.random.uniform(k_sc, (N,), jnp.float32, scale[0], scale[1])

    tan_sx = jnp.tan(jnp.deg2rad(sx_deg))

    # forward matrix M (src -> dst), kornia composition:
    #   [iso-scale about center, + translation] @ [x-shear about center]
    m00 = s
    m01 = -s * tan_sx
    m02 = s * tan_sx * cy + (1.0 - s) * cx + tx
    m11 = s
    m12 = (1.0 - s) * cy + ty

    # analytic inverse (m10 == 0)
    a00 = 1.0 / m00
    a01 = -m01 / (m00 * m11)
    a02 = (m01 * m12 - m02 * m11) / (m00 * m11)
    a11 = 1.0 / m11
    a12 = -m12 / m11

    zeros = jnp.zeros_like(a00)
    return jnp.stack([a00, a01, a02, a11, a12, zeros, zeros, zeros],
                     axis=-1).astype(jnp.float32)


# --------------------------------------------------------------------------
# Row-tile selection: multiple of 8 dividing H, bounded so the per-tile
# one-hot column-weight slab (TH * W * W * 4 bytes) stays small.
# --------------------------------------------------------------------------
def _pick_row_tile(H, W):
    if H % 8 != 0:
        return H                                   # full height (== array dim)
    wx_budget = 8 * 1024 * 1024                    # bytes for (TH, W, W) f32
    cap = max(8, min(128, wx_budget // (4 * W * W)))
    cap = min(cap, max(8, H // 2))                 # >= 2 row tiles when possible
    th = max(8, (cap // 8) * 8)
    while H % th != 0:
        th -= 8
    return th


# --------------------------------------------------------------------------
# Pallas kernel: bilinear affine warp of a TH-row tile (all C channels)
# --------------------------------------------------------------------------
def _make_affine_kernel(C, H, W, TH):
    f32 = jnp.float32

    def affine_kernel(coef_ref, x_ref, o_ref, tmp_ref):
        # coef_ref: (N*8,) f32 in SMEM
        # x_ref   : (1, C, H, W)  VMEM block (whole image; constant across row tiles)
        # o_ref   : (1, C, TH, W) VMEM block (current output row tile)
        # tmp_ref : (TH, C, W)    f32 VMEM scratch (row-pass result)
        b = pl.program_id(0)
        r = pl.program_id(1)
        base = b * 8
        a00 = coef_ref[base + 0]
        a01 = coef_ref[base + 1]
        a02 = coef_ref[base + 2]
        a11 = coef_ref[base + 3]
        a12 = coef_ref[base + 4]
        row0 = r * TH                                   # first output row of this tile

        # ---- row-interpolation weights Wy[o, y]: (TH_out, H_in) ------------
        o_ids_h = lax.broadcasted_iota(jnp.int32, (TH, H), 0) + row0
        y_ids = lax.broadcasted_iota(jnp.int32, (TH, H), 1)
        y_src = a11 * o_ids_h.astype(f32) + a12
        y0 = jnp.floor(y_src)
        wy = y_src - y0
        y0i = y0.astype(jnp.int32)
        # out-of-range taps never match an input-row id -> zeros padding
        Wy = jnp.where(y_ids == y0i, 1.0 - wy,
                       jnp.where(y_ids == y0i + 1, wy, 0.0))          # (TH, H)

        # ---- column-selection weights Wx[o, x_in, j_out]: (TH, W, W) -------
        o_ids_w = lax.broadcasted_iota(jnp.int32, (TH, W), 0) + row0
        j_ids = lax.broadcasted_iota(jnp.int32, (TH, W), 1)
        x_src = a00 * j_ids.astype(f32) + a01 * o_ids_w.astype(f32) + a02
        x0 = jnp.floor(x_src)
        wx = x_src - x0
        x0i = x0.astype(jnp.int32)[:, None, :]          # (TH, 1, W_out)
        wx3 = wx[:, None, :]                            # (TH, 1, W_out)
        xin_ids = lax.broadcasted_iota(jnp.int32, (TH, W, W), 1)
        Wx = jnp.where(xin_ids == x0i, 1.0 - wx3,
                       jnp.where(xin_ids == x0i + 1, wx3, 0.0))       # (TH, Win, Wout)

        # ---- row pass on the MXU: (TH, H) @ (H, W) per channel -------------
        for c in range(C):                                            # static, C small
            tmp_ref[:, c, :] = jnp.dot(Wy, x_ref[0, c].astype(f32),
                                       preferred_element_type=f32)    # (TH, W_in)

        # ---- column pass on the MXU: batched over output rows, channels
        #      folded into the rows of each per-batch matmul ----------------
        out = lax.dot_general(
            tmp_ref[...], Wx,
            dimension_numbers=(((2,), (1,)), ((0,), (0,))),
            preferred_element_type=f32)                               # (TH, C, W_out)

        for c in range(C):                                            # static, C small
            o_ref[0, c] = out[:, c, :].astype(o_ref.dtype)

    return affine_kernel


def affine_warp(image, coefs):
    """image: (N, C, H, W); coefs: (N, 8) inverse-affine coefficients."""
    N, C, H, W = image.shape
    TH = _pick_row_tile(H, W)
    R = H // TH
    kernel = _make_affine_kernel(C, H, W, TH)
    coefs_flat = coefs.reshape(-1).astype(jnp.float32)     # (N*8,) 1-D SMEM table

    itemsize = jnp.dtype(image.dtype).itemsize
    bytes_accessed = int(2 * N * C * H * W * itemsize + coefs_flat.size * 4)
    # row pass: 2*C*H*H*W MACs/image ; column pass: 2*C*H*W*W MACs/image
    flops = int(2 * N * C * H * W * (H + W))

    # per-step VMEM footprint (double-buffered blocks + weight/scratch slabs)
    f32b = 4
    in_blk = C * H * W * itemsize
    out_blk = C * TH * W * itemsize
    slabs = (TH * H + TH * W * W + 2 * TH * C * W + C * H * W) * f32b
    vmem_needed = 2 * (in_blk + out_blk) + slabs
    vmem_limit = int(min(64 * 1024 * 1024, max(32 * 1024 * 1024, 2 * vmem_needed)))

    return pl.pallas_call(
        kernel,
        out_shape=jax.ShapeDtypeStruct((N, C, H, W), image.dtype),
        grid=(N, R),
        in_specs=[
            pl.BlockSpec(memory_space=pltpu.MemorySpace.SMEM),          # flat coef table
            pl.BlockSpec((1, C, H, W), lambda b, r: (b, 0, 0, 0)),      # whole image (DMA'd once per b)
        ],
        out_specs=pl.BlockSpec((1, C, TH, W), lambda b, r: (b, 0, r, 0)),
        scratch_shapes=[pltpu.VMEM((TH, C, W), jnp.float32)],
        compiler_params=pltpu.CompilerParams(
            dimension_semantics=("parallel", "parallel"),
            vmem_limit_bytes=vmem_limit),
        cost_estimate=pl.CostEstimate(
            flops=flops, transcendentals=0, bytes_accessed=bytes_accessed),
    )(coefs_flat, image)


# --------------------------------------------------------------------------
# Module wrapper mirroring the PyTorch Affine module
# --------------------------------------------------------------------------
class Affine:
    """forward((image, cover, mask), key) -> random-affine-transformed image."""

    def __init__(self, degrees=0, translate=0.1, scale=(0.7, 0.7), shear=30, p=1):
        assert degrees == 0, "kernel exploits the rotation-free structure (y_src independent of x)"
        # TODO(synk): degrees != 0 (rotation) would require a full 2-D gather warp.
        assert p == 1, "only p=1 (always apply) is implemented"
        self.translate = float(translate)
        self.scale = (float(scale[0]), float(scale[1]))
        self.shear = float(shear)

    def forward(self, image_cover_mask, key):
        image = image_cover_mask[0]
        N, C, H, W = image.shape
        coefs = sample_affine_coefs(key, N, H, W, translate=self.translate,
                                    scale=self.scale, shear=self.shear)
        return affine_warp(image, coefs)

    __call__ = forward


# --------------------------------------------------------------------------
# Pure-JAX reference (4-tap bilinear gather) for correctness checking
# --------------------------------------------------------------------------
def _affine_warp_reference(image, coefs):
    N, C, H, W = image.shape

    def one(img, a):
        a00, a01, a02, a11, a12 = a[0], a[1], a[2], a[3], a[4]
        i = jnp.arange(H, dtype=jnp.float32)[:, None]
        j = jnp.arange(W, dtype=jnp.float32)[None, :]
        x_s = a00 * j + a01 * i + a02
        y_s = jnp.broadcast_to(a11 * i + a12, (H, W))
        x0 = jnp.floor(x_s)
        y0 = jnp.floor(y_s)
        wx = x_s - x0
        wy = y_s - y0
        x0i = x0.astype(jnp.int32)
        y0i = y0.astype(jnp.int32)
        imgf = img.astype(jnp.float32)

        def tap(yi, xi, w):
            valid = (yi >= 0) & (yi < H) & (xi >= 0) & (xi < W)
            v = imgf[:, jnp.clip(yi, 0, H - 1), jnp.clip(xi, 0, W - 1)]   # (C, H, W)
            return jnp.where(valid, w, 0.0)[None] * v

        out = (tap(y0i, x0i, (1 - wy) * (1 - wx))
               + tap(y0i, x0i + 1, (1 - wy) * wx)
               + tap(y0i + 1, x0i, wy * (1 - wx))
               + tap(y0i + 1, x0i + 1, wy * wx))
        return out.astype(img.dtype)

    return jax.vmap(one)(image, coefs)


if __name__ == "__main__":
    key = jax.random.PRNGKey(0)
    k_img, k_cover, k_mask, k_aff = jax.random.split(key, 4)
    N, C, H, W = 2, 4, 16, 16
    image = jax.random.uniform(k_img, (N, C, H, W), dtype=jnp.float32)
    cover = jax.random.uniform(k_cover, (N, C, H, W), dtype=jnp.float32)
    mask = jax.random.uniform(k_mask, (N, 1, H, W), dtype=jnp.float32)

    affine = Affine(degrees=0, translate=0.1, scale=[0.7, 0.7], shear=30, p=1)
    out = affine((image, cover, mask), k_aff)
    out = jax.block_until_ready(out)
    assert out.shape == (N, C, H, W) and out.dtype == image.dtype

    # Reference check: same sampled parameters, plain-JAX bilinear warp.
    coefs = sample_affine_coefs(k_aff, N, H, W,
                                translate=0.1, scale=(0.7, 0.7), shear=30.0)
    ref = _affine_warp_reference(image, coefs)
    np.testing.assert_allclose(np.asarray(out), np.asarray(ref),
                               rtol=1e-4, atol=1e-4)

    print("KERNEL_OK")
</pallas_src>

<mosaic_0001>
module attributes {stable_mosaic.version = 11 : i64} {
  func.func @affine_kernel(%arg0: i32, %arg1: i32, %arg2: memref<16xf32, #tpu.memory_space<smem>>, %arg3: memref<1x4x16x16xf32, #tpu.memory_space<vmem>>, %arg4: memref<1x4x8x16xf32, #tpu.memory_space<vmem>>, %arg5: memref<8x4x16xf32, #tpu.memory_space<vmem>>) attributes {dimension_semantics = [#tpu.dimension_semantics<parallel>, #tpu.dimension_semantics<parallel>], iteration_bounds = array<i64: 2, 2>, scalar_prefetch = 0 : i64, scratch_operands = 1 : i64, tpu.core_type = #tpu.core_type<tc>, window_params = [{transform_indices = @transform_0, window_bounds = array<i64: 16>}, {transform_indices = @transform_1, window_bounds = array<i64: 1, 4, 16, 16>}, {transform_indices = @transform_2, window_bounds = array<i64: 1, 4, 8, 16>}]} {
    %c8_i32 = arith.constant 8 : i32
    %0 = arith.muli %arg0, %c8_i32 : i32
    %c0_i32 = arith.constant 0 : i32
    %1 = arith.addi %0, %c0_i32 : i32
    %2 = arith.index_cast %1 : i32 to index
    %3 = memref.load %arg2[%2] : memref<16xf32, #tpu.memory_space<smem>>
    %c1_i32 = arith.constant 1 : i32
    %4 = arith.addi %0, %c1_i32 : i32
    %5 = arith.index_cast %4 : i32 to index
    %6 = memref.load %arg2[%5] : memref<16xf32, #tpu.memory_space<smem>>
    %c2_i32 = arith.constant 2 : i32
    %7 = arith.addi %0, %c2_i32 : i32
    %8 = arith.index_cast %7 : i32 to index
    %9 = memref.load %arg2[%8] : memref<16xf32, #tpu.memory_space<smem>>
    %c3_i32 = arith.constant 3 : i32
    %10 = arith.addi %0, %c3_i32 : i32
    %11 = arith.index_cast %10 : i32 to index
    %12 = memref.load %arg2[%11] : memref<16xf32, #tpu.memory_space<smem>>
    %c4_i32 = arith.constant 4 : i32
    %13 = arith.addi %0, %c4_i32 : i32
    %14 = arith.index_cast %13 : i32 to index
    %15 = memref.load %arg2[%14] : memref<16xf32, #tpu.memory_space<smem>>
    %c8_i32_0 = arith.constant 8 : i32
    %16 = arith.muli %arg1, %c8_i32_0 : i32
    %17 = tpu.iota {dimensions = array<i32: 0>} : vector<8x16xi32>
    %18 = vector.broadcast %16 : i32 to vector<8x16xi32>
    %19 = arith.addi %17, %18 : vector<8x16xi32>
    %20 = tpu.iota {dimensions = array<i32: 1>} : vector<8x16xi32>
    %21 = arith.sitofp %19 : vector<8x16xi32> to vector<8x16xf32>
    %22 = vector.broadcast %12 : f32 to vector<8x16xf32>
    %23 = arith.mulf %22, %21 : vector<8x16xf32>
    %24 = vector.broadcast %15 : f32 to vector<8x16xf32>
    %25 = arith.addf %23, %24 : vector<8x16xf32>
    %26 = math.floor %25 : vector<8x16xf32>
    %27 = arith.subf %25, %26 : vector<8x16xf32>
    %28 = arith.fptosi %26 : vector<8x16xf32> to vector<8x16xi32>
    %29 = arith.cmpi eq, %20, %28 : vector<8x16xi32>
    %cst = arith.constant 1.000000e+00 : f32
    %30 = vector.broadcast %cst : f32 to vector<8x16xf32>
    %31 = arith.subf %30, %27 : vector<8x16xf32>
    %c1_i32_1 = arith.constant 1 : i32
    %32 = vector.broadcast %c1_i32_1 : i32 to vector<8x16xi32>
    %33 = arith.addi %28, %32 : vector<8x16xi32>
    %34 = arith.cmpi eq, %20, %33 : vector<8x16xi32>
    %cst_2 = arith.constant 0.000000e+00 : f32
    %35 = vector.broadcast %cst_2 : f32 to vector<8x16xf32>
    %36 = arith.select %34, %27, %35 : vector<8x16xi1>, vector<8x16xf32>
    %37 = arith.select %29, %31, %36 : vector<8x16xi1>, vector<8x16xf32>
    %38 = tpu.iota {dimensions = array<i32: 0>} : vector<8x16xi32>
    %39 = vector.broadcast %16 : i32 to vector<8x16xi32>
    %40 = arith.addi %38, %39 : vector<8x16xi32>
    %41 = tpu.iota {dimensions = array<i32: 1>} : vector<8x16xi32>
    %42 = arith.sitofp %41 : vector<8x16xi32> to vector<8x16xf32>
    %43 = vector.broadcast %3 : f32 to vector<8x16xf32>
    %44 = arith.mulf %43, %42 : vector<8x16xf32>
    %45 = arith.sitofp %40 : vector<8x16xi32> to vector<8x16xf32>
    %46 = vector.broadcast %6 : f32 to vector<8x16xf32>
    %47 = arith.mulf %46, %45 : vector<8x16xf32>
    %48 = arith.addf %44, %47 : vector<8x16xf32>
    %49 = vector.broadcast %9 : f32 to vector<8x16xf32>
    %50 = arith.addf %48, %49 : vector<8x16xf32>
    %51 = math.floor %50 : vector<8x16xf32>
    %52 = arith.subf %50, %51 : vector<8x16xf32>
    %53 = arith.fptosi %51 : vector<8x16xf32> to vector<8x16xi32>
    %54 = vector.shape_cast %53 : vector<8x16xi32> to vector<8x1x16xi32>
    %55 = vector.shape_cast %52 : vector<8x16xf32> to vector<8x1x16xf32>
    %56 = tpu.iota {dimensions = array<i32: 1>} : vector<8x16x16xi32>
    %57 = vector.broadcast %54 : vector<8x1x16xi32> to vector<8x16x16xi32>
    %58 = arith.cmpi eq, %56, %57 : vector<8x16x16xi32>
    %cst_3 = arith.constant 1.000000e+00 : f32
    %59 = vector.broadcast %cst_3 : f32 to vector<8x1x16xf32>
    %60 = arith.subf %59, %55 : vector<8x1x16xf32>
    %c1_i32_4 = arith.constant 1 : i32
    %61 = vector.broadcast %c1_i32_4 : i32 to vector<8x1x16xi32>
    %62 = arith.addi %54, %61 : vector<8x1x16xi32>
    %63 = vector.broadcast %62 : vector<8x1x16xi32> to vector<8x16x16xi32>
    %64 = arith.cmpi eq, %56, %63 : vector<8x16x16xi32>
    %cst_5 = arith.constant 0.000000e+00 : f32
    %65 = vector.shape_cast %55 : vector<8x1x16xf32> to vector<8x1x16xf32>
    %66 = vector.broadcast %65 : vector<8x1x16xf32> to vector<8x16x16xf32>
    %67 = vector.broadcast %cst_5 : f32 to vector<8x16x16xf32>
    %68 = arith.select %64, %66, %67 : vector<8x16x16xi1>, vector<8x16x16xf32>
    %69 = vector.shape_cast %60 : vector<8x1x16xf32> to vector<8x1x16xf32>
    %70 = vector.broadcast %69 : vector<8x1x16xf32> to vector<8x16x16xf32>
    %71 = arith.select %58, %70, %68 : vector<8x16x16xi1>, vector<8x16x16xf32>
    %c0 = arith.constant 0 : index
    %c0_6 = arith.constant 0 : index
    %c0_7 = arith.constant 0 : index
    %c0_8 = arith.constant 0 : index
    %72 = vector.load %arg3[%c0, %c0_6, %c0_7, %c0_8] : memref<1x4x16x16xf32, #tpu.memory_space<vmem>>, vector<1x1x16x16xf32>
    %73 = vector.shape_cast %72 : vector<1x1x16x16xf32> to vector<16x16xf32>
    %cst_9 = arith.constant dense<0.000000e+00> : vector<8x16xf32>
    %74 = tpu.matmul %37, %73, %cst_9 {dimension_numbers = #tpu.dot_dimension_numbers<[1], [0], [0], [1], [0, 0, 1, 1], [], []>} : vector<8x16xf32>, vector<16x16xf32>, vector<8x16xf32> -> vector<8x16xf32>
    %c0_10 = arith.constant 0 : index
    %c0_11 = arith.constant 0 : index
    %c0_12 = arith.constant 0 : index
    %75 = vector.load %arg5[%c0_10, %c0_11, %c0_12] : memref<8x4x16xf32, #tpu.memory_space<vmem>>, vector<8x1x16xf32>
    %76 = vector.shape_cast %75 : vector<8x1x16xf32> to vector<8x16xf32>
    %77 = vector.shape_cast %74 : vector<8x16xf32> to vector<8x1x16xf32>
    tpu.vector_store %arg5[%c0_10, %c0_11, %c0_12], %77 {strides = array<i32>} : memref<8x4x16xf32, #tpu.memory_space<vmem>>, vector<8x1x16xf32>,
    %c0_13 = arith.constant 0 : index
    %c1 = arith.constant 1 : index
    %c0_14 = arith.constant 0 : index
    %c0_15 = arith.constant 0 : index
    %78 = vector.load %arg3[%c0_13, %c1, %c0_14, %c0_15] : memref<1x4x16x16xf32, #tpu.memory_space<vmem>>, vector<1x1x16x16xf32>
    %79 = vector.shape_cast %78 : vector<1x1x16x16xf32> to vector<16x16xf32>
    %cst_16 = arith.constant dense<0.000000e+00> : vector<8x16xf32>
    %80 = tpu.matmul %37, %79, %cst_16 {dimension_numbers = #tpu.dot_dimension_numbers<[1], [0], [0], [1], [0, 0, 1, 1], [], []>} : vector<8x16xf32>, vector<16x16xf32>, vector<8x16xf32> -> vector<8x16xf32>
    %c0_17 = arith.constant 0 : index
    %c1_18 = arith.constant 1 : index
    %c0_19 = arith.constant 0 : index
    %81 = vector.load %arg5[%c0_17, %c1_18, %c0_19] : memref<8x4x16xf32, #tpu.memory_space<vmem>>, vector<8x1x16xf32>
    %82 = vector.shape_cast %81 : vector<8x1x16xf32> to vector<8x16xf32>
    %83 = vector.shape_cast %80 : vector<8x16xf32> to vector<8x1x16xf32>
    tpu.vector_store %arg5[%c0_17, %c1_18, %c0_19], %83 {strides = array<i32>} : memref<8x4x16xf32, #tpu.memory_space<vmem>>, vector<8x1x16xf32>,
    %c0_20 = arith.constant 0 : index
    %c2 = arith.constant 2 : index
    %c0_21 = arith.constant 0 : index
    %c0_22 = arith.constant 0 : index
    %84 = vector.load %arg3[%c0_20, %c2, %c0_21, %c0_22] : memref<1x4x16x16xf32, #tpu.memory_space<vmem>>, vector<1x1x16x16xf32>
    %85 = vector.shape_cast %84 : vector<1x1x16x16xf32> to vector<16x16xf32>
    %cst_23 = arith.constant dense<0.000000e+00> : vector<8x16xf32>
    %86 = tpu.matmul %37, %85, %cst_23 {dimension_numbers = #tpu.dot_dimension_numbers<[1], [0], [0], [1], [0, 0, 1, 1], [], []>} : vector<8x16xf32>, vector<16x16xf32>, vector<8x16xf32> -> vector<8x16xf32>
    %c0_24 = arith.constant 0 : index
    %c2_25 = arith.constant 2 : index
    %c0_26 = arith.constant 0 : index
    %87 = vector.load %arg5[%c0_24, %c2_25, %c0_26] : memref<8x4x16xf32, #tpu.memory_space<vmem>>, vector<8x1x16xf32>
    %88 = vector.shape_cast %87 : vector<8x1x16xf32> to vector<8x16xf32>
    %89 = vector.shape_cast %86 : vector<8x16xf32> to vector<8x1x16xf32>
    tpu.vector_store %arg5[%c0_24, %c2_25, %c0_26], %89 {strides = array<i32>} : memref<8x4x16xf32, #tpu.memory_space<vmem>>, vector<8x1x16xf32>,
    %c0_27 = arith.constant 0 : index
    %c3 = arith.constant 3 : index
    %c0_28 = arith.constant 0 : index
    %c0_29 = arith.constant 0 : index
    %90 = vector.load %arg3[%c0_27, %c3, %c0_28, %c0_29] : memref<1x4x16x16xf32, #tpu.memory_space<vmem>>, vector<1x1x16x16xf32>
    %91 = vector.shape_cast %90 : vector<1x1x16x16xf32> to vector<16x16xf32>
    %cst_30 = arith.constant dense<0.000000e+00> : vector<8x16xf32>
    %92 = tpu.matmul %37, %91, %cst_30 {dimension_numbers = #tpu.dot_dimension_numbers<[1], [0], [0], [1], [0, 0, 1, 1], [], []>} : vector<8x16xf32>, vector<16x16xf32>, vector<8x16xf32> -> vector<8x16xf32>
    %c0_31 = arith.constant 0 : index
    %c3_32 = arith.constant 3 : index
    %c0_33 = arith.constant 0 : index
    %93 = vector.load %arg5[%c0_31, %c3_32, %c0_33] : memref<8x4x16xf32, #tpu.memory_space<vmem>>, vector<8x1x16xf32>
    %94 = vector.shape_cast %93 : vector<8x1x16xf32> to vector<8x16xf32>
    %95 = vector.shape_cast %92 : vector<8x16xf32> to vector<8x1x16xf32>
    tpu.vector_store %arg5[%c0_31, %c3_32, %c0_33], %95 {strides = array<i32>} : memref<8x4x16xf32, #tpu.memory_space<vmem>>, vector<8x1x16xf32>,
    %c0_34 = arith.constant 0 : index
    %c0_35 = arith.constant 0 : index
    %c0_36 = arith.constant 0 : index
    %96 = vector.load %arg5[%c0_34, %c0_35, %c0_36] : memref<8x4x16xf32, #tpu.memory_space<vmem>>, vector<8x4x16xf32>
    %cst_37 = arith.constant dense<0.000000e+00> : vector<8x4x16xf32>
    %97 = tpu.matmul %96, %71, %cst_37 {dimension_numbers = #tpu.dot_dimension_numbers<[2], [1], [1], [2], [0, 0, 0, 1, 1, 2], [0], [0]>} : vector<8x4x16xf32>, vector<8x16x16xf32>, vector<8x4x16xf32> -> vector<8x4x16xf32>
    %98 = vector.extract_strided_slice %97 {offsets = [0, 0, 0], sizes = [8, 1, 16], strides = [1, 1, 1]} : vector<8x4x16xf32> to vector<8x1x16xf32>
    %99 = vector.shape_cast %98 : vector<8x1x16xf32> to vector<8x16xf32>
    %c0_38 = arith.constant 0 : index
    %c0_39 = arith.constant 0 : index
    %c0_40 = arith.constant 0 : index
    %c0_41 = arith.constant 0 : index
    %100 = vector.load %arg4[%c0_38, %c0_39, %c0_40, %c0_41] : memref<1x4x8x16xf32, #tpu.memory_space<vmem>>, vector<1x1x8x16xf32>
    %101 = vector.shape_cast %100 : vector<1x1x8x16xf32> to vector<8x16xf32>
    %102 = vector.shape_cast %99 : vector<8x16xf32> to vector<1x1x8x16xf32>
    tpu.vector_store %arg4[%c0_38, %c0_39, %c0_40, %c0_41], %102 {strides = array<i32>} : memref<1x4x8x16xf32, #tpu.memory_space<vmem>>, vector<1x1x8x16xf32>,
    %103 = vector.extract_strided_slice %97 {offsets = [0, 1, 0], sizes = [8, 1, 16], strides = [1, 1, 1]} : vector<8x4x16xf32> to vector<8x1x16xf32>
    %104 = vector.shape_cast %103 : vector<8x1x16xf32> to vector<8x16xf32>
    %c0_42 = arith.constant 0 : index
    %c1_43 = arith.constant 1 : index
    %c0_44 = arith.constant 0 : index
    %c0_45 = arith.constant 0 : index
    %105 = vector.load %arg4[%c0_42, %c1_43, %c0_44, %c0_45] : memref<1x4x8x16xf32, #tpu.memory_space<vmem>>, vector<1x1x8x16xf32>
    %106 = vector.shape_cast %105 : vector<1x1x8x16xf32> to vector<8x16xf32>
    %107 = vector.shape_cast %104 : vector<8x16xf32> to vector<1x1x8x16xf32>
    tpu.vector_store %arg4[%c0_42, %c1_43, %c0_44, %c0_45], %107 {strides = array<i32>} : memref<1x4x8x16xf32, #tpu.memory_space<vmem>>, vector<1x1x8x16xf32>,
    %108 = vector.extract_strided_slice %97 {offsets = [0, 2, 0], sizes = [8, 1, 16], strides = [1, 1, 1]} : vector<8x4x16xf32> to vector<8x1x16xf32>
    %109 = vector.shape_cast %108 : vector<8x1x16xf32> to vector<8x16xf32>
    %c0_46 = arith.constant 0 : index
    %c2_47 = arith.constant 2 : index
    %c0_48 = arith.constant 0 : index
    %c0_49 = arith.constant 0 : index
    %110 = vector.load %arg4[%c0_46, %c2_47, %c0_48, %c0_49] : memref<1x4x8x16xf32, #tpu.memory_space<vmem>>, vector<1x1x8x16xf32>
    %111 = vector.shape_cast %110 : vector<1x1x8x16xf32> to vector<8x16xf32>
    %112 = vector.shape_cast %109 : vector<8x16xf32> to vector<1x1x8x16xf32>
    tpu.vector_store %arg4[%c0_46, %c2_47, %c0_48, %c0_49], %112 {strides = array<i32>} : memref<1x4x8x16xf32, #tpu.memory_space<vmem>>, vector<1x1x8x16xf32>,
    %113 = vector.extract_strided_slice %97 {offsets = [0, 3, 0], sizes = [8, 1, 16], strides = [1, 1, 1]} : vector<8x4x16xf32> to vector<8x1x16xf32>
    %114 = vector.shape_cast %113 : vector<8x1x16xf32> to vector<8x16xf32>
    %c0_50 = arith.constant 0 : index
    %c3_51 = arith.constant 3 : index
    %c0_52 = arith.constant 0 : index
    %c0_53 = arith.constant 0 : index
    %115 = vector.load %arg4[%c0_50, %c3_51, %c0_52, %c0_53] : memref<1x4x8x16xf32, #tpu.memory_space<vmem>>, vector<1x1x8x16xf32>
    %116 = vector.shape_cast %115 : vector<1x1x8x16xf32> to vector<8x16xf32>
    %117 = vector.shape_cast %114 : vector<8x16xf32> to vector<1x1x8x16xf32>
    tpu.vector_store %arg4[%c0_50, %c3_51, %c0_52, %c0_53], %117 {strides = array<i32>} : memref<1x4x8x16xf32, #tpu.memory_space<vmem>>, vector<1x1x8x16xf32>,
    return
  }
  func.func @transform_0(%arg0: i32, %arg1: i32) -> i32 {
    %c0_i32 = arith.constant 0 : i32
    %c0_i32_0 = arith.constant 0 : i32
    return %c0_i32 : i32
  }
  func.func @transform_1(%arg0: i32, %arg1: i32) -> (i32, i32, i32, i32) {
    %c0_i32 = arith.constant 0 : i32
    %c0_i32_0 = arith.constant 0 : i32
    %c0_i32_1 = arith.constant 0 : i32
    %c0_i32_2 = arith.constant 0 : i32
    return %arg0, %c0_i32, %c0_i32_0, %c0_i32_1 : i32, i32, i32, i32
  }
  func.func @transform_2(%arg0: i32, %arg1: i32) -> (i32, i32, i32, i32) {
    %c0_i32 = arith.constant 0 : i32
    %c0_i32_0 = arith.constant 0 : i32
    %c0_i32_1 = arith.constant 0 : i32
    return %arg0, %c0_i32, %arg1, %c0_i32_0 : i32, i32, i32, i32
  }
}

</mosaic_0001>

<bundles_post_ra>
// kernel: tpu_custom_call.1
= control target key start
LH: loop header
LB: loop body
LE: loop exit
PB: predicated region body
PF: predicated region fallthrough
CT: control target
= control target key end

     0   :  { %s3016_s0 = inlined_call_operand.hbm [shape: f32[16], index: 0, kind: input, shape index: {}]   ;;  %s3017_s1 = inlined_call_operand.hbm [shape: f32[2,4,16,16], index: 1, kind: input, shape index: {}]   ;;  %s3018_s2 = inlined_call_operand.hbm [shape: f32[2,4,16,16], index: 2, kind: output, shape index: {}]  }
   0x1   :  { %3026 = sst [smem:[#allocation15_spill]] %s3016_s0 }
   0x2   :  { %7 = vsyncpa [#allocation6], 0 }
   0x3   :  { %8 = vsyncpa [#allocation4], 0 }
   0x4   :  { %10 = vsyncpa [#allocation4 + $0x1], 0 }
   0x5   :  { %11 = vsyncpa [#allocation5], 0 }
   0x6   :  { %13 = vsyncpa [#allocation5 + $0x1], 0  ;;  %s2428_s9 = smov 0   ;;  %s2430_s10 = smov 0  }
   0x7   :  { %s2432_s11 = smov 0   ;;  %s2434_s12 = smov 0  }
   0x8   :  { %s2436_s13 = smov 0   ;;  %s2438_s14 = smov 0  }
   0x9   :  { %s2440_s15 = smov 0   ;;  %s2442_s16 = smov 0  }
   0xa   :  { %s2444_s17 = smov 0   ;;  %s2446_s18 = smov 0  }
   0xb   :  { %s2448_s19 = smov 0  }
   0xc LB: > { %3027 = sst [smem:[#allocation12_spill]] %s2391_s17  ;;  %s1904_s20 = sadd.s32 4294967295, %s2399_s19   ;;  %s2399_s19 = sphi %s2448_s19, %s19_s19   ;;  %s2395_s18 = sphi %s2446_s18, %s3056_s18   ;;  %s2391_s17 = sphi %s2444_s17, %s3055_s17   ;;  %s2387_s16 = sphi %s2442_s16, %s3054_s16   ;;  %s2383_s15 = sphi %s2440_s15, %s3046_s15   ;;  %s2379_s14 = sphi %s2438_s14, %s3053_s14   ;;  %s2375_s13 = sphi %s2436_s13, %s3052_s13   ;;  %s2371_s12 = sphi %s2434_s12, %s3051_s12   ;;  %s2367_s11 = sphi %s2432_s11, %s3050_s11   ;;  %s2363_s10 = sphi %s2430_s10, %s3049_s10   ;;  %s2359_s9 = sphi %s2428_s9, %s3048_s9  }
   0xd   : > { %s1905_s21 = sadd.s32 4294967294, %s2399_s19   ;;  %p66_p0 = scmp.ne.s32.totalorder %s2379_s14, %s2375_s13 }
   0xe   : > { %p67_p1 = scmp.eq.s32.totalorder %s2399_s19, 0  ;;  %p72_p2 = scmp.ne.s32.totalorder %s2375_s13, %s2371_s12 }
   0xf   : > { %p2488_p3 = scmp.eq.s32.totalorder %s1904_s20, 0  ;;  %p97_p5 = scmp.ne.s32.totalorder %s2367_s11, %s2363_s10 }
  0x10   : > { %p2493_p4 = por %p67_p1, %p66_p0  ;;  %p98_p7 = scmp.eq.s32.totalorder %s1904_s20, 3 }
  0x11   : > { %s3028_s23 = scalar_select %p2488_p3, 1, 0 }
  0x12   : > { %p2501_p6 = por %p2488_p3, %p72_p2  ;;  %p103_p8 = scmp.ne.s32.totalorder %s2363_s10, %s2359_s9 }
  0x13   : > { %p104_p9 = scmp.eq.s32.totalorder %s1905_s21, 3  ;;  %p2507_p10 = por %p98_p7, %p97_p5 }
  0x14   : > { %s3030_s26 = scalar_select %p2501_p6, 1, 0 }
  0x15   : > { %s3031_s27 = scalar_select %p2507_p10, 1, 0 }
  0x16   : > { %p1906_p11 = scmp.ge.s32.totalorder %s2399_s19, 1  ;;  %p2512_p12 = por %p104_p9, %p103_p8 }
  0x17   : > { %p111_p13 = scmp.lt.s32.totalorder %s2399_s19, 5  ;;  %p2129_p1 = scmp.lt.s32.totalorder %s2399_s19, 4 }
  0x18   : > { %s3032_s28 = scalar_select %p2512_p12, 1, 0 }
  0x19   : > { %p2517_p0 = pnand %p1906_p11, %p111_p13  ;;  %p2526_p6 = pnand %p2129_p1, %p2493_p4 }
  0x1a   : > { %3033 = sst [smem:[#allocation13_spill]] %s3032_s28  ;;  %s28_s3 = sadd.s32 1, %s2391_s17 }
  0x1b   : > { %p2116_p2 = pneg %p2517_p0  ;;  %p2533_p7 = scmp.ge.s32.totalorder %s28_s3, 2 }
  0x1c   : > { %s3037_s0 = sld [smem:[#allocation15_spill]] }
  0x1d   : > { %p2117_p5 = pnand %p2116_p2, %p2488_p3 }
  0x1f   : > { %p2232_p9 = pneg %p2117_p5 }
  0x22   : > { %s2230_s7 = scalar_lea.hbm %s3037_s0, 16 }
  0x23   : > { %p2231_p8 = scmp.ne.s32.totalorder %s3037_s0, %s2230_s7  ;;  %p2237_p13 = scmp.lt.u32.totalorder %s2230_s7, %s3037_s0 }
  0x25   : > { %p2233_p4 = pnand %p2232_p9, %p2231_p8 }
  0x27   : > { %p2234_p11 = pneg %p2233_p4 }
  0x29   : > { %p2239_p1 = pnand %p2237_p13, %p2234_p11 }
  0x2b   : > { %2242 = shalt.err (!%p2239_p1)
}
  0x2c   : > { %s2401_s25 = smov [#allocation3]   ;;  %s3058_s3 = smov (%p2533_p7, %s28_s3), 0 }
  0x2d   : > { %2119 = dma.hbm_to_smem (!%p2117_p5), %s3037_s0, 16, %s2401_s25, [#allocation6]  }
  0x2e   : > { %3038 = sst [smem:[#allocation14_spill]] %s3058_s3  ;;  %s31_s5 = sadd.s32 1, %s2395_s18 }
  0x2f   : > { %s133_s6 = sand.u32 1, %s2379_s14   ;;  %s3060_s5 = smov (!%p2533_p7, %s31_s5), %s2395_s18 }
  0x30   : > { %s83_s22 = ssub.s32 %s2391_s17, %s3058_s3  ;;  %p33_p2 = scmp.ge.s32.totalorder %s3060_s5, 2 }
  0x31   : > { %s1909_s24 = sshll.u32 %s133_s6, 6  ;;  %s1947_s7 = sshll.u32 %s2395_s18, 10 }
  0x32   : > { %s3062_s5 = smov (%p33_p2, %s3060_s5), 0  ;;  %s2566_s20 = scalar_lea.hbm %s3017_s1, %s1947_s7 }
  0x33   : > { %s137_s4 = scalar_lea.vmem [#allocation7], %s1909_s24  ;;  %s56_s25 = ssub.s32 %s2395_s18, %s3062_s5 }
  0x34   : > { %s144_s21 = sshll.u32 %s137_s4, 4  ;;  %p57_p5 = scmp.eq.s32.totalorder %s56_s25, 0  ;;  %s2570_s21 = int_to_ptr.vmem [resolvable:$true] %s144_s21 }
  0x35   : > { %s84_s0 = sor.u32 %s83_s22, %s56_s25  ;;  %s3039_s3 = sadd.s32 1, %s2379_s14 }
  0x36   : > { %p85_p7 = scmp.eq.s32.totalorder %s84_s0, 0  ;;  %s3040_s28 = sadd.s32 1, %s2367_s11 }
  0x37   : > { %s2575_s17 = scalar_select %p57_p5, %s2379_s14, %s3039_s3  }
  0x38   : > { %s2580_s8 = scalar_select %p85_p7, %s2367_s11, %s3040_s28  }
  0x39   : > { %s2582_s7 = scalar_lea.sflag [#allocation4], %s133_s6  ;;  %s2243_s12 = scalar_lea.hbm %s2566_s20, 1024 }
  0x3a   : > { %p2244_p8 = scmp.ne.s32.totalorder %s2566_s20, %s2243_s12  ;;  %p2245_p9 = pneg %p2526_p6 }
  0x3b   : > { %s2248_s0 = scalar_lea.hbm %s3017_s1, 2048  ;;  %p2249_p13 = scmp.lt.u32.totalorder %s2566_s20, %s3017_s1 }
  0x3c   : > { %p2246_p4 = pnand %p2245_p9, %p2244_p8  ;;  %p2250_p1 = scmp.lt.u32.totalorder %s2248_s0, %s2243_s12 }
  0x3d   : > { %p2252_p5 = scmp.lt.u32.totalorder %s2243_s12, %s2566_s20 }
  0x3e   : > { %p2247_p11 = pneg %p2246_p4  ;;  %p2251_p2 = por %p2250_p1, %p2249_p13 }
  0x40   : > { %p2253_p7 = por %p2252_p5, %p2251_p2 }
  0x42   : > { %p2254_p12 = pnand %p2253_p7, %p2247_p11 }
  0x44   : > { %2257 = shalt.err (!%p2254_p12)
}
  0x45   : > { %s2258_s28 = scalar_lea.vmem %s2570_s21, 1024  ;;  %s2402_s6 = smov [#allocation7]  }
  0x46   : > { %p2259_p8 = scmp.ne.s32.totalorder %s2570_s21, %s2258_s28  ;;  %s2263_s25 = sshll.u32 %s2402_s6, 4  ;;  %s2264_s25 = int_to_ptr.vmem [resolvable:$false] %s2263_s25 }
  0x47   : > { %s2265_s24 = scalar_lea.vmem %s2264_s25, 2048  ;;  %p2266_p3 = scmp.lt.s32.totalorder %s2570_s21, %s2264_s25 }
  0x48   : > { %p2261_p4 = pnand %p2259_p8, %p2245_p9  ;;  %p2267_p13 = scmp.lt.s32.totalorder %s2265_s24, %s2258_s28 }
  0x4a   : > { %p2262_p10 = pneg %p2261_p4  ;;  %p2268_p1 = por %p2267_p13, %p2266_p3 }
  0x4c   : > { %p2269_p2 = pnand %p2268_p1, %p2262_p10 }
  0x4e   : > { %2272 = shalt.err (!%p2269_p2)
}
  0x4f   : > { %s2403_s12 = smov 128   ;;  %s2404_s4 = smov 8  }
  0x50   : > { %2123 = dma.hbm_to_vmem [thread:$0]  (!%p2526_p6), %s2566_s20, 1024, %s2570_s21, %s2582_s7, %s2403_s12, %s2403_s12, %s2404_s4  }
  0x51   : > { %156 = sbr.rel (%p2517_p0) target bundleno = 604 (0x25c), region = 28  ;;  %p3041_p12 = scmp.ne.s32.totalorder (!%p2517_p0), %s3028_s23, 0 }
  0x58   : > { %2346 = dma.done.wait (%p3041_p12), [#allocation6], 16  }
  0x59   : > { %2348 = vsyncadd (%p3041_p12), [#allocation6], 4294967280  ;;  %s162_s0 = sand.u32 1, %s2375_s13   ;;  %p3042_p3 = scmp.ne.s32.totalorder %s3030_s26, 0 }
  0x5a   : > { %s1914_s22 = sshll.u32 %s162_s0, 6  ;;  %s163_s3 = scalar_lea.sflag [#allocation4], %s162_s0 }
  0x5b   : > { %s2617_s28 = scalar_lea.vmem [#allocation7], %s1914_s22 }
  0x5c   : > { %2350 = dma.done.wait (%p3042_p3), %s163_s3, 1024  }
  0x5d   : > { %2352 = vsyncadd (%p3042_p3), %s163_s3, 4294966272 }
  0x5e   : > { %171 = sfence }
  0x5f   : > { %v570_v0 = vld [vmem:[%s2617_s28] sm:$0xff]  ;;  %v571_v1 = vld [vmem:[%s2617_s28 + $0x8] sm:$0xff]  ;;  %v1919_v2 = vld [vmem:[%s2617_s28 + $0x10] sm:$0xff]  ;;  %v199_v3 = vlaneseq  ;;  %v2405_v4 = vmov 0.0|0.0   ;;  %s2630_s23 = sshll.u32 %s2387_s16, 3  ;;  %s1917_s26 = sshll.u32 %s2383_s15, 3 }
  0x60   : > { %2068 = vmatprep.subr.bf16.mxu0 %v2405_v4  ;;  %2071 = vmatprep.subr.bf16.mxu1 %v2405_v4  ;;  %v2069_v5 = vpack.c.bf16 %v571_v1, %v570_v0  ;;  %v1920_v6 = vld [vmem:[%s2617_s28 + $0x18] sm:$0xff]  ;;  %vm2406_vm0 = vmmov 0   ;;  %v2407_v8 = vmov 0.0   ;;  %s189_s29 = sld [smem:[#allocation3 + %s2630_s23]]  ;;  %s190_s30 = sadd.s32 1, %s2630_s23  ;;  %v201_v10 = vstv %s1917_s26  ;;  %v1922_v30 = vld [vmem:[%s2617_s28 + $0x20] sm:$0xff] }
  0x61   : > { %v2072_v7 = vpack.c.bf16 %v1920_v6, %v1919_v2  ;;  %1988 = vmatprep.mubr.msk.f32.mxu0 %vm2406_vm0, %v2407_v8  ;;  %1995 = vmatprep.mubr.msk.f32.mxu1 %vm2406_vm0, %v2407_v8  ;;  %v2639_v9 = vshrl.u32 %v199_v3, 7  ;;  %s191_s16 = sld [smem:[#allocation3 + %s190_s30]]  ;;  %s192_s20 = sadd.s32 2, %s2630_s23  ;;  %v204_v11 = vand.u32 127, %v199_v3  ;;  %v1923_v31 = vld [vmem:[%s2617_s28 + $0x28] sm:$0xff]  ;;  %v1925_v32 = vld [vmem:[%s2617_s28 + $0x30] sm:$0xff] }
  0x62   : > { %2070 = vmatpush3.bf16.msra.mxu0 %v2069_v5  ;;  %s193_s21 = sld [smem:[#allocation3 + %s192_s20]]  ;;  %s194_s7 = sadd.s32 3, %s2630_s23  ;;  %v1926_v33 = vld [vmem:[%s2617_s28 + $0x38] sm:$0xff]  ;;  %vm572_vm3 = vcmask 130048   ;;  %v2075_v36 = vpack.c.bf16 %v1923_v31, %v1922_v30  ;;  %v2408_v40 = vmov 1966171168  }
  0x63   : > { %2073 = vmatpush3.bf16.msra.mxu1 %v2072_v7  ;;  %2074 = vmatprep.subr.bf16.mxu0 %v2405_v4  ;;  %v202_v12 = vadd.s32 %v201_v10, %v2639_v9  ;;  %s195_s6 = sld [smem:[#allocation3 + %s194_s7]]  ;;  %s196_s25 = sadd.s32 4, %s2630_s23  ;;  %v219_v13 = vcvt.s32.f32 %v204_v11  ;;  %v2078_v37 = vpack.c.bf16 %v1926_v33, %v1925_v32  ;;  %v232_v41 = vunpack.c.l.s4 %v2408_v40 }
  0x64   : > { %2077 = vmatprep.subr.bf16.mxu1 %v2405_v4  ;;  %s197_s24 = sld [smem:[#allocation3 + %s196_s25]]  ;;  %v2675_v49 = vsub.s32 0, %v2639_v9  ;;  %v2683_v57 = vadd.s32 8, %v2639_v9  ;;  %s185_s12 = sand.u32 1, %s2363_s10  }
  0x65   : > { %v205_v14 = vcvt.s32.f32 %v202_v12  ;;  %v233_v43 = vunpack.c.0.s8 %v232_v41  ;;  %s1915_s4 = sshll.u32 %s185_s12, 5  ;;  %s1803_s0 = sadd.s32 %s2383_s15, %s2630_s23 }
  0x66   : > { %v220_v15 = vstv %s189_s29  ;;  %s1944_s15 = sshll.u32 %s1803_s0, 7  ;;  %s187_s22 = scalar_lea.vmem [#allocation8], %s1915_s4 }
  0x67   : > { %v221_v16 = vmul.f32 %v220_v15, %v219_v13  ;;  %v222_v17 = vstv %s191_s16  ;;  %v2666_v44 = vsub.s32 %v233_v43, %v2639_v9  ;;  %s1806_s3 = sshll.u32 %s187_s22, 4  ;;  %s2939_s26 = scalar_lea.hbm %s3018_s2, %s1944_s15  ;;  %s2945_s3 = int_to_ptr.vmem [resolvable:$true] %s1806_s3 }
  0x68   : > { %v223_v18 = vmul.f32 %v222_v17, %v205_v14  ;;  %v225_v20 = vstv %s193_s21  ;;  %s2955_s29 = scalar_lea.sflag [#allocation5], %s185_s12  ;;  %s2273_s30 = scalar_lea.vmem %s2945_s3, 512 }
  0x69   : > { %v206_v19 = vstv %s195_s6  ;;  %p2274_p6 = scmp.ne.s32.totalorder %s2945_s3, %s2273_s30  ;;  %p3043_p10 = scmp.ne.s32.totalorder %s3031_s27, 0 }
  0x6a   : > { %v207_v21 = vmul.f32 %v206_v19, %v205_v14  ;;  %v208_v22 = vstv %s197_s24  ;;  %v224_v23 = vadd.f32 %v223_v18, %v221_v16  ;;  %s2409_s16 = smov [#allocation8]  }
  0x6b   : > { %p2275_p0 = pnand %p2274_p6, %p3043_p10  ;;  %s2277_s20 = sshll.u32 %s2409_s16, 4  ;;  %s2278_s20 = int_to_ptr.vmem [resolvable:$false] %s2277_s20 }
  0x6c   : > { %v209_v24 = vadd.f32 %v208_v22, %v207_v21  ;;  %v226_v25 = vadd.f32 %v225_v20, %v224_v23  ;;  %s2279_s21 = scalar_lea.vmem %s2278_s20, 1024  ;;  %p2280_p11 = scmp.lt.s32.totalorder %s2945_s3, %s2278_s20 }
  0x6d   : > { %p2276_p9 = pneg %p2275_p0  ;;  %p2281_p5 = scmp.lt.s32.totalorder %s2279_s21, %s2273_s30 }
  0x6e   : > { %v210_v26 = vfloor.f32 %v209_v24  ;;  %v227_v42 = vfloor.f32 %v226_v25 }
  0x6f   : > { %p2282_p7 = por %p2281_p5, %p2280_p11 }
  0x70   : > { %v211_v27 = vsub.f32 %v209_v24, %v210_v26  ;;  %v2104_v28 = vtrunc.f32 %v210_v26  ;;  %v2106_v45 = vtrunc.f32 %v227_v42  ;;  %v2670_v47 = vsub.f32 %v226_v25, %v227_v42 }
  0x71   : > { %p2283_p8 = pnand %p2282_p7, %p2276_p9 }
  0x72   : > { %v2105_v29 = vcvt.f32.s32 %v2104_v28  ;;  %v214_v34 = vsub.f32 1.0, %v211_v27  ;;  %v2668_v46 = vcvt.f32.s32 %v2106_v45  ;;  %v287_v51 = vrot.slane %v2670_v47, %v2666_v44 }
  0x73   : > { %v280_v30 = vcombine.high %v2670_v47, %v2670_v47 }
  0x74   : > { %v215_v35 = vadd.s32 1, %v2105_v29  ;;  %vm213_vm1 = vcmp.eq.s32.totalorder %v204_v11, %v2105_v29  ;;  %v237_v48 = vrot.slane %v2668_v46, %v2666_v44  ;;  %v303_v53 = vrot.slane %v287_v51, %v2666_v44 }
  0x75   : > { %v295_v56 = vcombine.high %v287_v51, %v287_v51  ;;  %v230_v29 = vcombine.high %v2668_v46, %v2668_v46  ;;  %v294_v43 = vrot.slane %v280_v30, %v2666_v44 }
  0x76   : > { %vm216_vm2 = vcmp.eq.s32.totalorder %v204_v11, %v215_v35  ;;  %v253_v50 = vrot.slane %v237_v48, %v2666_v44  ;;  %v245_v52 = vcombine.high %v237_v48, %v237_v48  ;;  %v386_v58 = vsub.f32 1.0, %v303_v53 }
  0x77   : > { %v217_v38 = vsel %vm216_vm2, %v211_v27, 0.0  ;;  %v317_v60 = vrot.slane %v295_v56, %v2666_v44  ;;  %v453_v62 = vrot.slane %v303_v53, %v2675_v49  ;;  %v325_v15 = vcombine.high %v303_v53, %v303_v53 }
  0x78   : > { %v218_v39 = vsel %vm213_vm1, %v214_v34, %v217_v38  ;;  %v394_v54 = vadd.s32 1, %v253_v50  ;;  %v267_v55 = vrot.slane %v245_v52, %v2666_v44  ;;  %v341_v61 = vrot.slane %v253_v50, %v2675_v49 }
  0x79   : > { %1989 = vmatmul.mubr.msk.f32.vlgmr.msra.gmra.mrb[0].mxu0 %vm572_vm3, %v218_v39  ;;  %1996 = vmatmul.mubr.msk.f32.vlgmr.msra.gmra.mrb[0].mxu1 %vm572_vm3, %v218_v39  ;;  %v275_v0 = vcombine.high %v253_v50, %v253_v50  ;;  %v517_v1 = vrot.slane %v386_v58, %v2675_v49  ;;  %v387_v2 = vsub.f32 1.0, %v317_v60  ;;  %v457_v13 = vrot.slane %v317_v60, %v2675_v49 }
  0x7a   : > { %2076 = vmatpush3.bf16.msra.mxu0 %v2075_v36  ;;  %2079 = vmatpush3.bf16.msra.mxu1 %v2078_v37  ;;  %v405_v59 = vrot.slane %v394_v54, %v2675_v49  ;;  %v395_v63 = vadd.s32 1, %v267_v55  ;;  %vm370_vm6 = vcmp.eq.s32.totalorder %v2639_v9, %v341_v61  ;;  %vm371_vm7 = vcmp.eq.s32.totalorder %v2683_v57, %v341_v61 }
  0x7b   : > { %2002 = vmatprep.mubr.msk.f32.mxu0 %vm2406_vm0, %v2407_v8  ;;  %2009 = vmatprep.mubr.msk.f32.mxu1 %vm2406_vm0, %v2407_v8  ;;  %v345_v10 = vrot.slane %v267_v55, %v2675_v49  ;;  %v521_v14 = vrot.slane %v387_v2, %v2675_v49  ;;  %v349_v18 = vrot.slane %v275_v0, %v2675_v49  ;;  %v388_v19 = vsub.f32 1.0, %v325_v15 }
  0x7c   : > { %2080 = vmatprep.subr.bf16.mxu0 %v2405_v4  ;;  %2083 = vmatprep.subr.bf16.mxu1 %v2405_v4  ;;  %vm434_vm4 = vcmp.eq.s32.totalorder %v2639_v9, %v405_v59  ;;  %vm435_vm5 = vcmp.eq.s32.totalorder %v2683_v57, %v405_v59  ;;  %v409_v11 = vrot.slane %v395_v63, %v2675_v49  ;;  %v396_v22 = vadd.s32 1, %v275_v0 }
  0x7d   : > { %2003 = vmatmul.mubr.msk.f32.vlgmr.msra.gmra.mrb[2].mxu0 %vm572_vm3, %v218_v39  ;;  %2010 = vmatmul.mubr.msk.f32.vlgmr.msra.gmra.mrb[2].mxu1 %vm572_vm3, %v218_v39  ;;  %v490_v3 = vsel %vm434_vm4, %v453_v62, 0.0  ;;  %v491_v5 = vsel %vm435_vm5, %v453_v62, 0.0  ;;  %vm372_vm8 = vcmp.eq.s32.totalorder %v2639_v9, %v345_v10  ;;  %vm373_vm9 = vcmp.eq.s32.totalorder %v2683_v57, %v345_v10 }
  0x7e   : > { %2016 = vmatprep.mubr.msk.f32.mxu0 %vm2406_vm0, %v2407_v8  ;;  %2023 = vmatprep.mubr.msk.f32.mxu1 %vm2406_vm0, %v2407_v8  ;;  %v554_v6 = vsel %vm370_vm6, %v517_v1, %v490_v3  ;;  %v555_v7 = vsel %vm371_vm7, %v517_v1, %v491_v5  ;;  %vm436_vm10 = vcmp.eq.s32.totalorder %v2639_v9, %v409_v11 }
  0x7f   : > { %v2081_v12 = vpack.c.bf16 %v555_v7, %v554_v6  ;;  %vm437_vm11 = vcmp.eq.s32.totalorder %v2683_v57, %v409_v11  ;;  %v492_v16 = vsel %vm436_vm10, %v457_v13, 0.0  ;;  %v461_v23 = vrot.slane %v325_v15, %v2675_v49 }
  0x80   : > { %v493_v17 = vsel %vm437_vm11, %v457_v13, 0.0  ;;  %v556_v20 = vsel %vm372_vm8, %v521_v14, %v492_v16  ;;  %vm375_vm12 = vcmp.eq.s32.totalorder %v2683_v57, %v349_v18  ;;  %v525_v25 = vrot.slane %v388_v19, %v2675_v49 }
  0x81   : > { %2082 = vmatpush3.bf16.msra.mxu0 %v2081_v12  ;;  %v557_v21 = vsel %vm373_vm9, %v521_v14, %v493_v17  ;;  %v413_v26 = vrot.slane %v396_v22, %v2675_v49  ;;  %v277_v27 = vcombine.high %v267_v55, %v267_v55  ;;  %v327_v28 = vcombine.high %v317_v60, %v317_v60 }
  0x82   : > { %2086 = vmatprep.subr.bf16.mxu0 %v2405_v4  ;;  %v2084_v24 = vpack.c.bf16 %v557_v21, %v556_v20  ;;  %vm374_vm13 = vcmp.eq.s32.totalorder %v2639_v9, %v349_v18  ;;  %v244_v42 = vrot.slane %v230_v29, %v2666_v44  ;;  %v310_v50 = vrot.slane %v294_v43, %v2666_v44 }
  0x83   : > { %vm438_vm14 = vcmp.eq.s32.totalorder %v2639_v9, %v413_v26  ;;  %vm439_vm15 = vcmp.eq.s32.totalorder %v2683_v57, %v413_v26  ;;  %v353_v31 = vrot.slane %v277_v27, %v2675_v49  ;;  %v389_v32 = vsub.f32 1.0, %v327_v28 }
  0x84   : > { %2085 = vmatpush3.bf16.msra.mxu1 %v2084_v24  ;;  %v494_v33 = vsel %vm438_vm14, %v461_v23, 0.0  ;;  %v495_v34 = vsel %vm439_vm15, %v461_v23, 0.0  ;;  %v397_v35 = vadd.s32 1, %v277_v27  ;;  %v465_v36 = vrot.slane %v327_v28, %v2675_v49 }
  0x85   : > { %2089 = vmatprep.subr.bf16.mxu1 %v2405_v4  ;;  %v2718_v37 = vsel %vm374_vm13, %v525_v25, %v494_v33  ;;  %v2722_v38 = vsel %vm375_vm12, %v525_v25, %v495_v34  ;;  %vm377_vm1 = vcmp.eq.s32.totalorder %v2683_v57, %v353_v31  ;;  %v529_v41 = vrot.slane %v389_v32, %v2675_v49 }
  0x86   : > { %v2087_v39 = vpack.c.bf16 %v2722_v38, %v2718_v37  ;;  %v417_v40 = vrot.slane %v397_v35, %v2675_v49  ;;  %vm376_vm2 = vcmp.eq.s32.totalorder %v2639_v9, %v353_v31  ;;  %v260_v45 = vrot.slane %v244_v42, %v2666_v44 }
  0x87   : > { %v246_v46 = vcombine.high %v244_v42, %v244_v42  ;;  %v296_v51 = vcombine.high %v294_v43, %v294_v43  ;;  %v390_v58 = vsub.f32 1.0, %v310_v50  ;;  %v469_v59 = vrot.slane %v310_v50, %v2675_v49 }
  0x88   : > { %vm440_vm4 = vcmp.eq.s32.totalorder %v2639_v9, %v417_v40  ;;  %vm441_vm5 = vcmp.eq.s32.totalorder %v2683_v57, %v417_v40  ;;  %v357_v54 = vrot.slane %v260_v45, %v2675_v49  ;;  %v398_v55 = vadd.s32 1, %v260_v45 }
  0x89   : > { %v496_v47 = vsel %vm440_vm4, %v465_v36, 0.0  ;;  %v497_v48 = vsel %vm441_vm5, %v465_v36, 0.0  ;;  %v274_v60 = vrot.slane %v246_v46, %v2666_v44  ;;  %v324_v62 = vrot.slane %v296_v51, %v2666_v44 }
  0x8a   : > { %v2736_v52 = vsel %vm376_vm2, %v529_v41, %v496_v47  ;;  %v2740_v53 = vsel %vm377_vm1, %v529_v41, %v497_v48  ;;  %vm378_vm6 = vcmp.eq.s32.totalorder %v2639_v9, %v357_v54  ;;  %vm379_vm7 = vcmp.eq.s32.totalorder %v2683_v57, %v357_v54 }
  0x8b   : > { %v2090_v56 = vpack.c.bf16 %v2740_v53, %v2736_v52  ;;  %v421_v61 = vrot.slane %v398_v55, %v2675_v49  ;;  %v533_v63 = vrot.slane %v390_v58, %v2675_v49  ;;  %v361_v0 = vrot.slane %v274_v60, %v2675_v49 }
  0x8c   : > { %v399_v1 = vadd.s32 1, %v274_v60  ;;  %v276_v2 = vcombine.high %v260_v45, %v260_v45  ;;  %v391_v3 = vsub.f32 1.0, %v324_v62  ;;  %v473_v5 = vrot.slane %v324_v62, %v2675_v49 }
  0x8d   : > { %vm442_vm8 = vcmp.eq.s32.totalorder %v2639_v9, %v421_v61  ;;  %vm443_vm9 = vcmp.eq.s32.totalorder %v2683_v57, %v421_v61  ;;  %vm380_vm10 = vcmp.eq.s32.totalorder %v2639_v9, %v361_v0  ;;  %vm381_vm11 = vcmp.eq.s32.totalorder %v2683_v57, %v361_v0 }
  0x8e   : > { %v498_v6 = vsel %vm442_vm8, %v469_v59, 0.0  ;;  %v499_v7 = vsel %vm443_vm9, %v469_v59, 0.0  ;;  %v425_v12 = vrot.slane %v399_v1, %v2675_v49  ;;  %v537_v13 = vrot.slane %v391_v3, %v2675_v49 }
  0x8f   : > { %v2760_v10 = vsel %vm378_vm6, %v533_v63, %v498_v6  ;;  %v2764_v11 = vsel %vm379_vm7, %v533_v63, %v499_v7  ;;  %v326_v15 = vcombine.high %v310_v50, %v310_v50  ;;  %v365_v16 = vrot.slane %v276_v2, %v2675_v49 }
  0x90   : > { %v2093_v14 = vpack.c.bf16 %v2764_v11, %v2760_v10  ;;  %v400_v17 = vadd.s32 1, %v276_v2  ;;  %vm444_vm12 = vcmp.eq.s32.totalorder %v2639_v9, %v425_v12  ;;  %vm445_vm13 = vcmp.eq.s32.totalorder %v2683_v57, %v425_v12 }
  0x91   : > { %v278_v18 = vcombine.high %v274_v60, %v274_v60  ;;  %v328_v19 = vcombine.high %v324_v62, %v324_v62  ;;  %v500_v20 = vsel %vm444_vm12, %v473_v5, 0.0  ;;  %v501_v21 = vsel %vm445_vm13, %v473_v5, 0.0 }
  0x92   : > { %vm382_vm14 = vcmp.eq.s32.totalorder %v2639_v9, %v365_v16  ;;  %vm383_vm15 = vcmp.eq.s32.totalorder %v2683_v57, %v365_v16  ;;  %v2777_v22 = vsel %vm380_vm10, %v537_v13, %v500_v20  ;;  %v2781_v23 = vsel %vm381_vm11, %v537_v13, %v501_v21 }
  0x93   : > { %v392_v24 = vsub.f32 1.0, %v326_v15  ;;  %v429_v25 = vrot.slane %v400_v17, %v2675_v49  ;;  %v2096_v26 = vpack.c.bf16 %v2781_v23, %v2777_v22  ;;  %v477_v27 = vrot.slane %v326_v15, %v2675_v49 }
  0x94   : > { %v369_v28 = vrot.slane %v278_v18, %v2675_v49  ;;  %v393_v29 = vsub.f32 1.0, %v328_v19  ;;  %v401_v31 = vadd.s32 1, %v278_v18  ;;  %v481_v40 = vrot.slane %v328_v19, %v2675_v49 }
  0x95   : > { %vm446_vm1 = vcmp.eq.s32.totalorder %v2639_v9, %v429_v25  ;;  %vm447_vm2 = vcmp.eq.s32.totalorder %v2683_v57, %v429_v25  ;;  %v541_v30 = vrot.slane %v392_v24, %v2675_v49  ;;  %vm704_vm8 = vcmask 122880  }
  0x96   : > { %v502_v32 = vsel %vm446_vm1, %v477_v27, 0.0  ;;  %v503_v33 = vsel %vm447_vm2, %v477_v27, 0.0  ;;  %vm385_vm4 = vcmp.eq.s32.totalorder %v2683_v57, %v369_v28  ;;  %v433_v36 = vrot.slane %v401_v31, %v2675_v49 }
  0x97   : > { %v2794_v34 = vsel %vm382_vm14, %v541_v30, %v502_v32  ;;  %v2798_v35 = vsel %vm383_vm15, %v541_v30, %v503_v33  ;;  %vm384_vm5 = vcmp.eq.s32.totalorder %v2639_v9, %v369_v28  ;;  %v545_v42 = vrot.slane %v393_v29, %v2675_v49 }
  0x98   : > { %v2099_v41 = vpack.c.bf16 %v2798_v35, %v2794_v34  ;;  %vm448_vm6 = vcmp.eq.s32.totalorder %v2639_v9, %v433_v36  ;;  %vm449_vm7 = vcmp.eq.s32.totalorder %v2683_v57, %v433_v36  ;;  %vm1731_vm9 = vcmask 1041409  }
  0x99   : > { %v504_v43 = vsel %vm448_vm6, %v481_v40, 0.0  ;;  %v505_v45 = vsel %vm449_vm7, %v481_v40, 0.0  ;;  %vm1734_vm10 = vcmask 1042434   ;;  %vm1737_vm11 = vcmask 1043459  }
  0x9a   : > { %v2808_v46 = vsel %vm384_vm5, %v545_v42, %v504_v43  ;;  %v2810_v47 = vsel %vm385_vm4, %v545_v42, %v505_v45  ;;  %vm1740_vm12 = vcmask 1044484   ;;  %vm1743_vm13 = vcmask 1045509  }
  0x9b   : > { %v2102_v48 = vpack.c.bf16 %v2810_v47, %v2808_v46  ;;  %vm1749_vm14 = vcmask 1047559   ;;  %vm1787_vm15 = vcmask 130051   ;;  %vm1774_vm1 = vcmask 130050  }
  0x9c   : > { %vm1762_vm2 = vcmask 130049   ;;  %vm1776_vm4 = vcmask 123904   ;;  %vm1789_vm5 = vcmask 124928  }
 0x14c   : > { %v642_v50 = vpop.f32.mrb[0].mxu0  ;;  %v782_v51 = vpop.f32.mrb[0].mxu1 }
 0x14d   : > { %v647_v54 = vcombine.high %v642_v50, %v642_v50  ;;  %v654_v55 = vrot.slane %v642_v50, %v2666_v44  ;;  %v787_v58 = vcombine.high %v782_v51, %v782_v51  ;;  %v794_v49 = vrot.slane %v782_v51, %v2666_v44  ;;  %v1990_v9 = vpop.f32.mrb[1].mxu0  ;;  %v1997_v59 = vpop.f32.mrb[1].mxu1 }
 0x14f   : > { %v661_v57 = vrot.slane %v647_v54, %v2666_v44  ;;  %v662_v60 = vcombine.high %v654_v55, %v654_v55  ;;  %v670_v61 = vrot.slane %v654_v55, %v2666_v44  ;;  %v801_v62 = vrot.slane %v787_v58, %v2666_v44 }
 0x150   : > { %v802_v63 = vcombine.high %v794_v49, %v794_v49  ;;  %v810_v0 = vrot.slane %v794_v49, %v2666_v44  ;;  %v921_v1 = vpop.f32.mrb[2].mxu0  ;;  %v1060_v2 = vpop.f32.mrb[2].mxu1 }
 0x151   : > { %v663_v3 = vcombine.high %v661_v57, %v661_v57  ;;  %v677_v5 = vrot.slane %v661_v57, %v2666_v44  ;;  %v684_v6 = vrot.slane %v662_v60, %v2666_v44  ;;  %v692_v7 = vcombine.high %v670_v61, %v670_v61  ;;  %705 = vst.msk [vmem:[#allocation2] sm:$0x1] %vm704_vm8, %v670_v61  ;;  %v2004_v12 = vpop.f32.mrb[3].mxu0  ;;  %v2011_v13 = vpop.f32.mrb[3].mxu1 }
 0x152   : > { %v803_v15 = vcombine.high %v801_v62, %v801_v62  ;;  %v817_v16 = vrot.slane %v801_v62, %v2666_v44  ;;  %v824_v17 = vrot.slane %v802_v63, %v2666_v44  ;;  %v832_v18 = vcombine.high %v810_v0, %v810_v0  ;;  %844 = vst.msk [vmem:[#allocation2 + $0x1] sm:$0x1] %vm704_vm8, %v810_v0 }
 0x153   : > { %v691_v19 = vrot.slane %v663_v3, %v2666_v44  ;;  %v693_v20 = vcombine.high %v677_v5, %v677_v5  ;;  %v694_v21 = vcombine.high %v684_v6, %v684_v6  ;;  %706 = vst.msk [vmem:[#allocation2 + $0x4] sm:$0x1] %vm704_vm8, %v684_v6  ;;  %707 = vst.msk [vmem:[#allocation2 + $0x8] sm:$0x1] %vm704_vm8, %v692_v7 }
 0x154   : > { %709 = vst.msk [vmem:[#allocation2 + $0x10] sm:$0x1] %vm704_vm8, %v677_v5  ;;  %v926_v24 = vcombine.high %v921_v1, %v921_v1  ;;  %v831_v25 = vrot.slane %v803_v15, %v2666_v44  ;;  %v833_v27 = vcombine.high %v817_v16, %v817_v16  ;;  %v834_v28 = vcombine.high %v824_v17, %v824_v17 }
 0x155   : > { %845 = vst.msk [vmem:[#allocation2 + $0x5] sm:$0x1] %vm704_vm8, %v824_v17  ;;  %846 = vst.msk [vmem:[#allocation2 + $0x9] sm:$0x1] %vm704_vm8, %v832_v18  ;;  %v933_v29 = vrot.slane %v921_v1, %v2666_v44  ;;  %v695_v30 = vcombine.high %v691_v19, %v691_v19  ;;  %v1065_v32 = vcombine.high %v1060_v2, %v1060_v2 }
 0x156   : > { %848 = vst.msk [vmem:[#allocation2 + $0x11] sm:$0x1] %vm704_vm8, %v817_v16  ;;  %708 = vst.msk [vmem:[#allocation2 + $0xc] sm:$0x1] %vm704_vm8, %v694_v21  ;;  %v940_v31 = vrot.slane %v926_v24, %v2666_v44  ;;  %v1072_v33 = vrot.slane %v1060_v2, %v2666_v44  ;;  %v835_v36 = vcombine.high %v831_v25, %v831_v25 }
 0x157   : > { %710 = vst.msk [vmem:[#allocation2 + $0x14] sm:$0x1] %vm704_vm8, %v691_v19  ;;  %711 = vst.msk [vmem:[#allocation2 + $0x18] sm:$0x1] %vm704_vm8, %v693_v20  ;;  %v941_v40 = vcombine.high %v933_v29, %v933_v29  ;;  %v949_v42 = vrot.slane %v933_v29, %v2666_v44  ;;  %v1079_v50 = vrot.slane %v1065_v32, %v2666_v44 }
 0x158   : > { %847 = vst.msk [vmem:[#allocation2 + $0xd] sm:$0x1] %vm704_vm8, %v834_v28  ;;  %849 = vst.msk [vmem:[#allocation2 + $0x15] sm:$0x1] %vm704_vm8, %v831_v25  ;;  %v942_v43 = vcombine.high %v940_v31, %v940_v31  ;;  %v956_v45 = vrot.slane %v940_v31, %v2666_v44  ;;  %v1080_v51 = vcombine.high %v1072_v33, %v1072_v33 }
 0x159   : > { %850 = vst.msk [vmem:[#allocation2 + $0x19] sm:$0x1] %vm704_vm8, %v833_v27  ;;  %712 = vst.msk [vmem:[#allocation2 + $0x1c] sm:$0x1] %vm704_vm8, %v695_v30  ;;  %v963_v54 = vrot.slane %v941_v40, %v2666_v44  ;;  %v971_v55 = vcombine.high %v949_v42, %v949_v42  ;;  %v1088_v58 = vrot.slane %v1072_v33, %v2666_v44 }
 0x15a   : > { %851 = vst.msk [vmem:[#allocation2 + $0x1d] sm:$0x1] %vm704_vm8, %v835_v36  ;;  %983 = vst.msk [vmem:[#allocation2 + $0x2] sm:$0x1] %vm704_vm8, %v949_v42  ;;  %v970_v49 = vrot.slane %v942_v43, %v2666_v44  ;;  %v972_v9 = vcombine.high %v956_v45, %v956_v45  ;;  %v1081_v59 = vcombine.high %v1079_v50, %v1079_v50 }
 0x15b   : > { %987 = vst.msk [vmem:[#allocation2 + $0x12] sm:$0x1] %vm704_vm8, %v956_v45  ;;  %v1095_v57 = vrot.slane %v1079_v50, %v2666_v44  ;;  %v973_v60 = vcombine.high %v963_v54, %v963_v54  ;;  %984 = vst.msk [vmem:[#allocation2 + $0x6] sm:$0x1] %vm704_vm8, %v963_v54  ;;  %v1102_v61 = vrot.slane %v1080_v51, %v2666_v44 }
 0x15c   : > { %985 = vst.msk [vmem:[#allocation2 + $0xa] sm:$0x1] %vm704_vm8, %v971_v55  ;;  %v1110_v62 = vcombine.high %v1088_v58, %v1088_v58  ;;  %1122 = vst.msk [vmem:[#allocation2 + $0x3] sm:$0x1] %vm704_vm8, %v1088_v58  ;;  %v974_v63 = vcombine.high %v970_v49, %v970_v49  ;;  %v1109_v0 = vrot.slane %v1081_v59, %v2666_v44 }
 0x15d   : > { %988 = vst.msk [vmem:[#allocation2 + $0x16] sm:$0x1] %vm704_vm8, %v970_v49  ;;  %989 = vst.msk [vmem:[#allocation2 + $0x1a] sm:$0x1] %vm704_vm8, %v972_v9  ;;  %v1111_v1 = vcombine.high %v1095_v57, %v1095_v57  ;;  %v1112_v2 = vcombine.high %v1102_v61, %v1102_v61 }
 0x15e   : > { %1126 = vst.msk [vmem:[#allocation2 + $0x13] sm:$0x1] %vm704_vm8, %v1095_v57  ;;  %986 = vst.msk [vmem:[#allocation2 + $0xe] sm:$0x1] %vm704_vm8, %v973_v60  ;;  %v1113_v3 = vcombine.high %v1109_v0, %v1109_v0 }
 0x15f   : > { %1123 = vst.msk [vmem:[#allocation2 + $0x7] sm:$0x1] %vm704_vm8, %v1102_v61  ;;  %1124 = vst.msk [vmem:[#allocation2 + $0xb] sm:$0x1] %vm704_vm8, %v1110_v62 }
 0x160   : > { %990 = vst.msk [vmem:[#allocation2 + $0x1e] sm:$0x1] %vm704_vm8, %v974_v63  ;;  %1127 = vst.msk [vmem:[#allocation2 + $0x17] sm:$0x1] %vm704_vm8, %v1109_v0 }
 0x161   : > { %1128 = vst.msk [vmem:[#allocation2 + $0x1b] sm:$0x1] %vm704_vm8, %v1111_v1  ;;  %1125 = vst.msk [vmem:[#allocation2 + $0xf] sm:$0x1] %vm704_vm8, %v1112_v2 }
 0x162   : > { %1129 = vst.msk [vmem:[#allocation2 + $0x1f] sm:$0x1] %vm704_vm8, %v1113_v3 }
 0x163   : > { %v1130_v44 = vld [vmem:[#allocation2] sm:$0xf] }
 0x164   : > { %2017 = vmatmul.mubr.msk.f32.vlgmr.msra.gmra.mrb[4].mxu0 %vm572_vm3, %v1130_v44 }
 0x165   : > { %2088 = vmatpush3.bf16.msra.mxu0 %v2087_v39  ;;  %2030 = vmatprep.mubr.msk.f32.mxu0 %vm2406_vm0, %v2407_v8  ;;  %v1134_v38 = vld [vmem:[#allocation2 + $0x10] sm:$0xf] }
 0x166   : > { %v1131_v5 = vld [vmem:[#allocation2 + $0x4] sm:$0xf]  ;;  %2092 = vmatprep.subr.bf16.mxu0 %v2405_v4  ;;  %v1132_v6 = vld [vmem:[#allocation2 + $0x8] sm:$0xf] }
 0x167   : > { %2024 = vmatmul.mubr.msk.f32.vlgmr.msra.gmra.mrb[4].mxu1 %vm572_vm3, %v1131_v5  ;;  %v1135_v39 = vld [vmem:[#allocation2 + $0x14] sm:$0xf] }
 0x168   : > { %2091 = vmatpush3.bf16.msra.mxu1 %v2090_v56  ;;  %2037 = vmatprep.mubr.msk.f32.mxu1 %vm2406_vm0, %v2407_v8  ;;  %v1133_v37 = vld [vmem:[#allocation2 + $0xc] sm:$0xf]  ;;  %v1136_v52 = vld [vmem:[#allocation2 + $0x18] sm:$0xf] }
 0x169   : > { %2031 = vmatmul.mubr.msk.f32.vlgmr.msra.gmra.mrb[6].mxu0 %vm572_vm3, %v1132_v6  ;;  %2095 = vmatprep.subr.bf16.mxu1 %v2405_v4 }
 0x16a   : > { %2094 = vmatpush3.bf16.msra.mxu0 %v2093_v14  ;;  %2044 = vmatprep.mubr.msk.f32.mxu0 %vm2406_vm0, %v2407_v8 }
 0x16b   : > { %2038 = vmatmul.mubr.msk.f32.vlgmr.msra.gmra.mrb[6].mxu1 %vm572_vm3, %v1133_v37  ;;  %2098 = vmatprep.subr.bf16.mxu0 %v2405_v4 }
 0x16c   : > { %2097 = vmatpush3.bf16.msra.mxu1 %v2096_v26  ;;  %2051 = vmatprep.mubr.msk.f32.mxu1 %vm2406_vm0, %v2407_v8 }
 0x16d   : > { %2045 = vmatmul.mubr.msk.f32.vlgmr.msra.gmra.mrb[8].mxu0 %vm572_vm3, %v1134_v38  ;;  %2101 = vmatprep.subr.bf16.mxu1 %v2405_v4  ;;  %v1137_v4 = vld [vmem:[#allocation2 + $0x1c] sm:$0xf] }
 0x16e   : > { %2100 = vmatpush3.bf16.msra.mxu0 %v2099_v41  ;;  %2058 = vmatprep.mubr.msk.f32.mxu0 %vm2406_vm0, %v2407_v8 }
 0x16f   : > { %2052 = vmatmul.mubr.msk.f32.vlgmr.msra.gmra.mrb[8].mxu1 %vm572_vm3, %v1135_v39 }
 0x170   : > { %2103 = vmatpush3.bf16.msra.mxu1 %v2102_v48  ;;  %2065 = vmatprep.mubr.msk.f32.mxu1 %vm2406_vm0, %v2407_v8  ;;  %vm1746_vm0 = vcmask 1046534  }
 0x171   : > { %2059 = vmatmul.mubr.msk.f32.vlgmr.msra.gmra.mrb[10].mxu0 %vm572_vm3, %v1136_v52 }
 0x173   : > { %2066 = vmatmul.mubr.msk.f32.vlgmr.msra.gmra.mrb[10].mxu1 %vm572_vm3, %v1137_v4 }
 0x237   : > { %v1207_v53 = vpop.f32.mrb[4].mxu0 }
 0x238   : > { %v2018_v56 = vpop.f32.mrb[5].mxu0 }
 0x23a   : > { %v1280_v10 = vpop.f32.mrb[4].mxu1 }
 0x23b   : > { %v1730_v11 = vrot.slane %v1280_v10, 7  ;;  %v2025_v14 = vpop.f32.mrb[5].mxu1 }
 0x23c   : > { %v1353_v22 = vpop.f32.mrb[6].mxu0 }
 0x23d   : > { %v1732_v8 = vsel %vm1731_vm9, %v1730_v11, %v1207_v53  ;;  %v1753_v23 = vsel %vm1734_vm10, %v1730_v11, %v1207_v53  ;;  %v1765_v26 = vsel %vm1737_vm11, %v1730_v11, %v1207_v53  ;;  %v1778_v34 = vsel %vm1740_vm12, %v1730_v11, %v1207_v53  ;;  %v2032_v35 = vpop.f32.mrb[7].mxu0 }
 0x23e   : > { %v1733_v41 = vrot.slane %v1353_v22, 6  ;;  %v1426_v46 = vpop.f32.mrb[6].mxu1 }
 0x23f   : > { %v1736_v47 = vrot.slane %v1426_v46, 5  ;;  %v2039_v48 = vpop.f32.mrb[7].mxu1 }
 0x240   : > { %v1735_v7 = vsel %vm1734_vm10, %v1733_v41, %v1732_v8  ;;  %v1754_v12 = vsel %vm1737_vm11, %v1733_v41, %v1753_v23  ;;  %v1766_v13 = vsel %vm1740_vm12, %v1733_v41, %v1765_v26  ;;  %v1779_v15 = vsel %vm1743_vm13, %v1733_v41, %v1778_v34  ;;  %v1499_v16 = vpop.f32.mrb[8].mxu0 }
 0x241   : > { %v1738_v17 = vsel %vm1737_vm11, %v1736_v47, %v1735_v7  ;;  %v1755_v18 = vsel %vm1740_vm12, %v1736_v47, %v1754_v12  ;;  %v1767_v19 = vsel %vm1743_vm13, %v1736_v47, %v1766_v13  ;;  %v1780_v20 = vsel %vm1746_vm0, %v1736_v47, %v1779_v15  ;;  %v2046_v21 = vpop.f32.mrb[9].mxu0 }
 0x242   : > { %v1739_v24 = vrot.slane %v1499_v16, 4  ;;  %v1572_v25 = vpop.f32.mrb[8].mxu1 }
 0x243   : > { %v1742_v27 = vrot.slane %v1572_v25, 3  ;;  %v2053_v28 = vpop.f32.mrb[9].mxu1 }
 0x244   : > { %v1741_v29 = vsel %vm1740_vm12, %v1739_v24, %v1738_v17  ;;  %v1756_v30 = vsel %vm1743_vm13, %v1739_v24, %v1755_v18  ;;  %v1768_v31 = vsel %vm1746_vm0, %v1739_v24, %v1767_v19  ;;  %v1781_v32 = vsel %vm1749_vm14, %v1739_v24, %v1780_v20  ;;  %v1645_v33 = vpop.f32.mrb[10].mxu0 }
 0x245   : > { %1940 = vst.msk [vmem:[%s187_s22 + $0x15] sm:$0xf8] %vm1787_vm15, %v1781_v32  ;;  %v1744_v36 = vsel %vm1743_vm13, %v1742_v27, %v1741_v29  ;;  %v1757_v40 = vsel %vm1746_vm0, %v1742_v27, %v1756_v30  ;;  %v1769_v42 = vsel %vm1749_vm14, %v1742_v27, %v1768_v31  ;;  %v1745_v43 = vrot.slane %v1645_v33, 2  ;;  %v2060_v45 = vpop.f32.mrb[11].mxu0 }
 0x246   : > { %1938 = vst.msk [vmem:[%s187_s22 + $0xe] sm:$0xfc] %vm1774_vm1, %v1769_v42  ;;  %v1718_v50 = vpop.f32.mrb[10].mxu1 }
 0x247   : > { %v1747_v51 = vsel %vm1746_vm0, %v1745_v43, %v1744_v36  ;;  %v1758_v54 = vsel %vm1749_vm14, %v1745_v43, %v1757_v40  ;;  %v1782_v55 = vsel %vm1731_vm9, %v1745_v43, %v1742_v27  ;;  %v1748_v58 = vrot.slane %v1718_v50, 1  ;;  %v2067_v49 = vpop.f32.mrb[11].mxu1 }
 0x248   : > { %1936 = vst.msk [vmem:[%s187_s22 + $0x7] sm:$0xfe] %vm1762_vm2, %v1758_v54 }
 0x249   : > { %v1750_v9 = vsel %vm1749_vm14, %v1748_v58, %v1747_v51  ;;  %1937 = vst.msk [vmem:[%s187_s22 + $0xf] sm:$0x1] %vm704_vm8, %v1748_v58  ;;  %v1770_v59 = vsel %vm1731_vm9, %v1748_v58, %v1745_v43  ;;  %v1783_v57 = vsel %vm1734_vm10, %v1748_v58, %v1782_v55 }
 0x24a   : > { %1752 = vst.msk [vmem:[%s187_s22] sm:$0xff] %vm572_vm3, %v1750_v9 }
 0x24b   : > { %1939 = vst.msk [vmem:[%s187_s22 + $0x16] sm:$0x3] %vm1776_vm4, %v1770_v59 }
 0x24c   : > { %1941 = vst.msk [vmem:[%s187_s22 + $0x1d] sm:$0x7] %vm1789_vm5, %v1783_v57 }
 0x24d   : > { %2286 = shalt.err (!%p2283_p8)
}
 0x24e   : > { %s2287_s7 = scalar_lea.hbm %s2939_s26, 512  ;;  %s2291_s24 = scalar_lea.hbm %s3018_s2, 2048 }
 0x24f   : > { %p2288_p4 = scmp.ne.s32.totalorder %s2939_s26, %s2287_s7  ;;  %p2292_p2 = scmp.lt.u32.totalorder %s2939_s26, %s3018_s2 }
 0x250   : > { %p2293_p12 = scmp.lt.u32.totalorder %s2291_s24, %s2287_s7  ;;  %p2295_p6 = scmp.lt.u32.totalorder %s2287_s7, %s2939_s26 }
 0x251   : > { %p2289_p13 = pnand %p2288_p4, %p3043_p10 }
 0x252   : > { %p2294_p3 = por %p2293_p12, %p2292_p2 }
 0x253   : > { %p2290_p1 = pneg %p2289_p13 }
 0x254   : > { %p2296_p0 = por %p2295_p6, %p2294_p3 }
 0x256   : > { %p2297_p9 = pnand %p2296_p0, %p2290_p1 }
 0x258   : > { %2300 = shalt.err (!%p2297_p9)
}
 0x259   : > { %s2410_s0 = smov 128   ;;  %s2411_s15 = smov 256  }
 0x25a   : > { %s2412_s22 = smov 8  }
 0x25b   : > { %2114 = dma.vmem_to_hbm [thread:$0]  (%p3043_p10), %s2945_s3, 512, %s2939_s26, %s2955_s29, %s2410_s0, %s2411_s15, %s2412_s22  }
 0x25c PF: > { %s3044_s28 = sld [smem:[#allocation13_spill]]  ;;  %p2131_p11 = scmp.ge.s32.totalorder %s2399_s19, 2 }
 0x25d   : > { %s1821_s23 = sand.u32 1, %s2359_s9  }
 0x25e   : > { %s1822_s30 = scalar_lea.sflag [#allocation5], %s1821_s23 }
 0x262   : > { %p3045_p5 = scmp.ne.s32.totalorder %s3044_s28, 0 }
 0x264   : > { %p2125_p7 = pnand %p2131_p11, %p3045_p5 }
 0x266   : > { %2354 = dma.done.wait (!%p2125_p7), %s1822_s30, 512  }
 0x267   : > { %2356 = vsyncadd (!%p2125_p7), %s1822_s30, 4294966784  ;;  %s19_s19 = sadd.s32 1, %s2399_s19   ;;  %s3046_s15 = sld [smem:[#allocation12_spill]] }
 0x268   : > { %p16_p8 = scmp.ge.s32.totalorder %s19_s19, 6   ;;  %s3047_s27 = sld [smem:[#allocation14_spill]] }
 0x269   : > { %s3048_s9 = smov %s2363_s10  ;;  %s3049_s10 = smov %s2367_s11 }
 0x26a   : > { %s3050_s11 = smov %s2580_s8  ;;  %s3051_s12 = smov %s2375_s13 }
 0x26b   : > { %s3052_s13 = smov %s2379_s14  ;;  %s3053_s14 = smov %s2575_s17 }
 0x26c   : > { %s3054_s16 = smov %s2395_s18  ;;  %s3056_s18 = smov %s3062_s5 }
 0x26d   :  { %18 = sbr.rel (!%p16_p8) target bundleno = 12 (0xc), region = 84 }
 0x26e   : > { %s3055_s17 = smov %s3047_s27 }
 0x274   :  { %1827 = vsyncpa [#allocation4], 1 }
 0x275   :  { %1829 = vsyncpa [#allocation4 + $0x1], 1 }
 0x276   :  { %1830 = vsyncpa [#allocation5], 1 }
 0x277   :  { %1832 = vsyncpa [#allocation5 + $0x1], 1 }
 0x278   :  { %1833 = vsyncpa [#allocation6], 1 }
 0x279   :  { %1835 = vsyncpa [#allocation6 + $0x1], 1 }

</bundles_post_ra>
